<compile_context>
chip_gen: v5e
topology: v5e:2x2
jax: 0.10.0
libtpu: 0.0.40
codegen_flags: <defaults>
</compile_context>

<pallas_src>
import jax
import jax.numpy as jnp
from jax.experimental import pallas as pl
from jax.experimental.pallas import tpu as pltpu

n_embed = 128     # C
head_size = 16
block_size = 32   # max sequence length supported by the causal mask
dropout = 0.1     # nn.Dropout is identity in eval/inference mode (see TODO below)

_LANE = 128


def head_kernel(x_ref, wqkv_ref, o_ref):
    """One self-attention head for a block of Bb batch elements.

    x_ref    : (Bb, T, C)            VMEM (bf16 or f32)
    wqkv_ref : (C, 2*qk_pad + hs)    VMEM, columns [Wq*C^-0.5 |0..| Wk |0..| Wv]
    o_ref    : (Bb, T, hs)           VMEM
    """
    Bb, T, C = x_ref.shape
    hs = o_ref.shape[-1]
    qk = (wqkv_ref.shape[-1] - hs) // 2          # 128-aligned width of the q/k groups

    # --- fused Q/K/V projection: one (Bb*T, C) x (C, 2*qk+hs) MXU matmul, f32 acc ---
    xf = x_ref[...].reshape(Bb * T, C)
    qkv = jnp.dot(xf, wqkv_ref[...], preferred_element_type=jnp.float32)

    # Lane-aligned slices (each group starts on a 128-lane boundary -> cheap views).
    # The C**-0.5 scale is already folded into the Wq columns.
    q = qkv[:, 0:qk].reshape(Bb, T, qk)
    k = qkv[:, qk:2 * qk].reshape(Bb, T, qk)
    v = qkv[:, 2 * qk:2 * qk + hs].reshape(Bb, T, hs)

    # --- scores: batched q.k^T; the zero-padded lanes of q/k contribute nothing -----
    s = jnp.einsum('btd,bsd->bts', q, k,
                   preferred_element_type=jnp.float32)                   # (Bb, T, T)

    # Causal mask as an additive f32 bias (0 on/below diag, -1e30 above).
    row = jax.lax.broadcasted_iota(jnp.int32, (T, T), 0)
    col = jax.lax.broadcasted_iota(jnp.int32, (T, T), 1)
    bias = jnp.where(col <= row, 0.0, -1e30).astype(jnp.float32)
    s = s + bias[None, :, :]

    # --- softmax, all in f32 (exact reciprocal; EUP-cheap at this size) -------------
    s = s - jnp.max(s, axis=-1, keepdims=True)
    p = jnp.exp(s)
    p = p * pl.reciprocal(jnp.sum(p, axis=-1, keepdims=True), approx=False)

    # TODO(synk): nn.Dropout(p=0.1) is identity in eval/inference mode; a training-mode
    # kernel would use pltpu.prng_seed + pltpu.prng_random_bits here.

    # --- weighted sum of values (batched), f32 acc -----------------------------------
    out = jnp.einsum('bts,bsd->btd', p, v,
                     preferred_element_type=jnp.float32)                  # (Bb, T, hs)
    o_ref[...] = out.astype(o_ref.dtype)


def _num_tensorcores() -> int:
    """Best-effort TensorCore count of the local chip (v7x has 2, v5e/v6e have 1)."""
    try:
        kind = jax.devices()[0].device_kind.lower()
    except Exception:
        return 1
    return 2 if "v7" in kind else 1


def _pick_batch_block(B, T, *, max_rows=2048):
    """Batch elements per grid step.

    - One grid step per TensorCore: v5e/v6e run the grid as a serial loop, so a single
      big step minimizes the ~0.35us/step overhead; v7x gets exactly 2 balanced
      'parallel' steps (one per core).
    - Capped so Bb*T <= max_rows (512-2048 rows reaches ~85% of HBM roofline while
      bounding the f32 qkv/scores VMEM footprint).
    - Never collapses toward tiny blocks for small B; non-divisible B is padded by the
      wrapper instead of shrinking the block.
    """
    bb = pl.cdiv(B, _num_tensorcores())
    bb = min(bb, max(1, max_rows // T))
    return max(1, bb)


def _fuse_qkv_weights(wq, wk, wv, compute_dtype):
    """Pack [Wq*C^-0.5 | Wk | Wv] into one matrix, padding the Wq/Wk column groups to a
    128-lane boundary so in-kernel slices are lane-aligned.  In a real model this would
    be done once at parameter-init time."""
    C, hs = wq.shape
    qk_pad = pl.cdiv(hs, _LANE) * _LANE
    pad = ((0, 0), (0, qk_pad - hs))
    wq_s = jnp.pad(wq * (C ** -0.5), pad)      # fold the reference's C**-0.5 scale
    wk_p = jnp.pad(wk, pad)
    wqkv = jnp.concatenate([wq_s, wk_p, wv], axis=1)   # (C, 2*qk_pad + hs)
    return wqkv.astype(compute_dtype)


def head_forward(x, wq, wk, wv, *, compute_dtype=jnp.bfloat16, batch_block=None):
    B, T, C = x.shape
    hs = wq.shape[1]
    assert T <= block_size, "sequence length exceeds causal-mask block_size"
    assert wq.shape == wk.shape == wv.shape and wq.shape[0] == C

    out_dtype = x.dtype                       # module semantics: output dtype follows x
    wqkv = _fuse_qkv_weights(wq, wk, wv, compute_dtype)
    x_c = x.astype(compute_dtype)             # halves HBM bytes for the dominant stream

    if batch_block is None:
        batch_block = _pick_batch_block(B, T)
    grid_b = pl.cdiv(B, batch_block)
    b_pad = grid_b * batch_block
    if b_pad != B:                            # pad instead of shrinking the block to 1
        x_c = jnp.pad(x_c, ((0, b_pad - B), (0, 0), (0, 0)))

    wcols = wqkv.shape[1]
    out = pl.pallas_call(
        head_kernel,
        out_shape=jax.ShapeDtypeStruct((b_pad, T, hs), out_dtype),
        grid=(grid_b,),
        in_specs=[
            pl.BlockSpec((batch_block, T, C), lambda b: (b, 0, 0)),   # x batch block
            pl.BlockSpec((C, wcols), lambda b: (0, 0)),               # fused W, resident
        ],
        out_specs=pl.BlockSpec((batch_block, T, hs), lambda b: (b, 0, 0)),
        compiler_params=pltpu.CompilerParams(
            dimension_semantics=("parallel",),
            vmem_limit_bytes=32 * 1024 * 1024,   # raise v5e's 16 MiB default headroom
        ),
    )(x_c, wqkv)
    return out[:B] if b_pad != B else out


def reference_forward(x, wq, wk, wv):
    """Pure-JAX f32 reference matching the PyTorch module (eval mode)."""
    B, T, C = x.shape
    k = x @ wk
    q = x @ wq
    v = x @ wv
    wei = (q @ jnp.swapaxes(k, -2, -1)) * (C ** -0.5)
    tril = jnp.tril(jnp.ones((block_size, block_size)))
    wei = jnp.where(tril[:T, :T] == 0, -jnp.inf, wei)
    wei = jax.nn.softmax(wei, axis=-1)
    return wei @ v


if __name__ == "__main__":
    C, hs = n_embed, head_size
    key = jax.random.PRNGKey(0)
    kx, kk, kq, kv, kx2 = jax.random.split(key, 5)

    # deterministic Linear-style init (uniform +/- 1/sqrt(C)), pre-transposed to (C, hs)
    bound = 1.0 / (C ** 0.5)
    wk = jax.random.uniform(kk, (C, hs), jnp.float32, -bound, bound)
    wq = jax.random.uniform(kq, (C, hs), jnp.float32, -bound, bound)
    wv = jax.random.uniform(kv, (C, hs), jnp.float32, -bound, bound)

    # Small shape consistent with the module usage: B=2, T=8, C=128.
    x = jax.random.normal(kx, (2, 8, C), dtype=jnp.float32)
    ref = reference_forward(x, wq, wk, wv)

    # f32 compute path: tight numerical check vs the reference.
    out_f32 = jax.block_until_ready(head_forward(x, wq, wk, wv, compute_dtype=jnp.float32))
    assert out_f32.shape == (2, 8, hs)
    assert jnp.allclose(out_f32, ref, atol=1e-3, rtol=1e-3), "f32 path mismatch"

    # bf16 default (perf) path: f32 accumulation + f32 softmax; looser tolerance.
    out_bf16 = jax.block_until_ready(head_forward(x, wq, wk, wv))
    assert out_bf16.dtype == x.dtype
    assert jnp.allclose(out_bf16, ref, atol=2e-2, rtol=2e-2), "bf16 path mismatch"

    # Second shape: full causal block (T=32) and a larger batch to exercise blocking.
    x2 = jax.random.normal(kx2, (64, block_size, C), dtype=jnp.float32)
    out2 = jax.block_until_ready(head_forward(x2, wq, wk, wv))
    ref2 = reference_forward(x2, wq, wk, wv)
    assert jnp.allclose(out2, ref2, atol=2e-2, rtol=2e-2), "bf16 path (T=32) mismatch"

    print("KERNEL_OK")
</pallas_src>

<mosaic_0001>
module attributes {stable_mosaic.version = 11 : i64} {
  func.func @head_kernel(%arg0: i32, %arg1: memref<2x8x128xf32, #tpu.memory_space<vmem>>, %arg2: memref<128x272xf32, #tpu.memory_space<vmem>>, %arg3: memref<2x8x16xf32, #tpu.memory_space<vmem>>) attributes {dimension_semantics = [#tpu.dimension_semantics<parallel>], iteration_bounds = array<i64: 1>, scalar_prefetch = 0 : i64, scratch_operands = 0 : i64, tpu.core_type = #tpu.core_type<tc>, window_params = [{transform_indices = @transform_0, window_bounds = array<i64: 2, 8, 128>}, {pipeline_mode = #tpu.pipeline_mode<synchronous>, transform_indices = @transform_1, window_bounds = array<i64: 128, 272>}, {transform_indices = @transform_2, window_bounds = array<i64: 2, 8, 16>}]} {
    %c0 = arith.constant 0 : index
    %c0_0 = arith.constant 0 : index
    %c0_1 = arith.constant 0 : index
    %0 = vector.load %arg1[%c0, %c0_0, %c0_1] : memref<2x8x128xf32, #tpu.memory_space<vmem>>, vector<2x8x128xf32>
    %1 = vector.shape_cast %0 : vector<2x8x128xf32> to vector<16x128xf32>
    %c0_2 = arith.constant 0 : index
    %c0_3 = arith.constant 0 : index
    %2 = vector.load %arg2[%c0_2, %c0_3] : memref<128x272xf32, #tpu.memory_space<vmem>>, vector<128x272xf32>
    %cst = arith.constant dense<0.000000e+00> : vector<16x272xf32>
    %3 = tpu.matmul %1, %2, %cst {dimension_numbers = #tpu.dot_dimension_numbers<[1], [0], [0], [1], [0, 0, 1, 1], [], []>} : vector<16x128xf32>, vector<128x272xf32>, vector<16x272xf32> -> vector<16x272xf32>
    %4 = vector.extract_strided_slice %3 {offsets = [0, 0], sizes = [16, 128], strides = [1, 1]} : vector<16x272xf32> to vector<16x128xf32>
    %5 = vector.shape_cast %4 : vector<16x128xf32> to vector<2x8x128xf32>
    %6 = vector.extract_strided_slice %3 {offsets = [0, 128], sizes = [16, 128], strides = [1, 1]} : vector<16x272xf32> to vector<16x128xf32>
    %7 = vector.shape_cast %6 : vector<16x128xf32> to vector<2x8x128xf32>
    %8 = vector.extract_strided_slice %3 {offsets = [0, 256], sizes = [16, 16], strides = [1, 1]} : vector<16x272xf32> to vector<16x16xf32>
    %9 = vector.shape_cast %8 : vector<16x16xf32> to vector<2x8x16xf32>
    "tpu.trace_start"() <{level = 10 : i32, message = "btd,bsd->bts"}> : () -> ()
    %cst_4 = arith.constant dense<0.000000e+00> : vector<2x8x8xf32>
    %10 = tpu.matmul %5, %7, %cst_4 {dimension_numbers = #tpu.dot_dimension_numbers<[2], [2], [1], [1], [0, 0, 0, 1, 1, 1], [0], [0]>} : vector<2x8x128xf32>, vector<2x8x128xf32>, vector<2x8x8xf32> -> vector<2x8x8xf32>
    "tpu.trace_stop"() : () -> ()
    %11 = tpu.iota {dimensions = array<i32: 0>} : vector<8x8xi32>
    %12 = tpu.iota {dimensions = array<i32: 1>} : vector<8x8xi32>
    %13 = arith.cmpi sle, %12, %11 : vector<8x8xi32>
    %cst_5 = arith.constant 0.000000e+00 : f32
    %cst_6 = arith.constant -1.000000e+30 : f32
    %14 = vector.broadcast %cst_5 : f32 to vector<8x8xf32>
    %15 = vector.broadcast %cst_6 : f32 to vector<8x8xf32>
    %16 = arith.select %13, %14, %15 : vector<8x8xi1>, vector<8x8xf32>
    %17 = vector.shape_cast %16 : vector<8x8xf32> to vector<1x8x8xf32>
    %18 = vector.broadcast %17 : vector<1x8x8xf32> to vector<2x8x8xf32>
    %19 = arith.addf %10, %18 : vector<2x8x8xf32>
    %cst_7 = arith.constant dense<0xFF800000> : vector<2x8xf32>
    %20 = vector.multi_reduction <maximumf>, %19, %cst_7 [2] : vector<2x8x8xf32> to vector<2x8xf32>
    %21 = vector.shape_cast %20 : vector<2x8xf32> to vector<2x8x1xf32>
    %22 = vector.broadcast %21 : vector<2x8x1xf32> to vector<2x8x8xf32>
    %23 = arith.subf %19, %22 : vector<2x8x8xf32>
    %24 = math.exp %23 : vector<2x8x8xf32>
    %cst_8 = arith.constant dense<0.000000e+00> : vector<2x8xf32>
    %25 = vector.multi_reduction <add>, %24, %cst_8 [2] : vector<2x8x8xf32> to vector<2x8xf32>
    %26 = vector.shape_cast %25 : vector<2x8xf32> to vector<2x8x1xf32>
    %27 = tpu.reciprocal %26 : vector<2x8x1xf32> -> vector<2x8x1xf32>
    %28 = vector.broadcast %27 : vector<2x8x1xf32> to vector<2x8x8xf32>
    %29 = arith.mulf %24, %28 : vector<2x8x8xf32>
    "tpu.trace_start"() <{level = 10 : i32, message = "bts,bsd->btd"}> : () -> ()
    %cst_9 = arith.constant dense<0.000000e+00> : vector<2x8x16xf32>
    %30 = tpu.matmul %29, %9, %cst_9 {dimension_numbers = #tpu.dot_dimension_numbers<[2], [1], [1], [2], [0, 0, 0, 1, 1, 2], [0], [0]>} : vector<2x8x8xf32>, vector<2x8x16xf32>, vector<2x8x16xf32> -> vector<2x8x16xf32>
    "tpu.trace_stop"() : () -> ()
    %c0_10 = arith.constant 0 : index
    %c0_11 = arith.constant 0 : index
    %c0_12 = arith.constant 0 : index
    %31 = vector.load %arg3[%c0_10, %c0_11, %c0_12] : memref<2x8x16xf32, #tpu.memory_space<vmem>>, vector<2x8x16xf32>
    tpu.vector_store %arg3[%c0_10, %c0_11, %c0_12], %30 {strides = array<i32>} : memref<2x8x16xf32, #tpu.memory_space<vmem>>, vector<2x8x16xf32>,
    return
  }
  func.func @transform_0(%arg0: i32) -> (i32, i32, i32) {
    %c0_i32 = arith.constant 0 : i32
    %c0_i32_0 = arith.constant 0 : i32
    %c0_i32_1 = arith.constant 0 : i32
    return %arg0, %c0_i32, %c0_i32_0 : i32, i32, i32
  }
  func.func @transform_1(%arg0: i32) -> (i32, i32) {
    %c0_i32 = arith.constant 0 : i32
    %c0_i32_0 = arith.constant 0 : i32
    %c0_i32_1 = arith.constant 0 : i32
    return %c0_i32, %c0_i32_0 : i32, i32
  }
  func.func @transform_2(%arg0: i32) -> (i32, i32, i32) {
    %c0_i32 = arith.constant 0 : i32
    %c0_i32_0 = arith.constant 0 : i32
    %c0_i32_1 = arith.constant 0 : i32
    return %arg0, %c0_i32, %c0_i32_0 : i32, i32, i32
  }
}

</mosaic_0001>

<bundles_post_ra>
// kernel: tpu_custom_call.1
= control target key start
LH: loop header
LB: loop body
LE: loop exit
PB: predicated region body
PF: predicated region fallthrough
CT: control target
= control target key end

     0   :  { %s511_s0 = inlined_call_operand.vmem [shape: f32[2,8,128], index: 0, kind: input, shape index: {}]   ;;  %s512_s1 = inlined_call_operand.vmem [shape: f32[128,272], index: 1, kind: input, shape index: {}]   ;;  %s513_s2 = inlined_call_operand.hbm [shape: f32[2,8,16], index: 2, kind: output, shape index: {}]  }
   0x1   :  { %v60_v0 = vld [vmem:[%s512_s1 + $0x170] sm:$0xff]  ;;  %v57_v1 = vld [vmem:[%s512_s1 + $0x158] sm:$0xff]  ;;  %v59_v2 = vld [vmem:[%s512_s1 + $0x168] sm:$0xff] }
   0x2   :  { %85 = vmatpush.msra.mxu1 %v60_v0  ;;  %62 = vmatpush.msra.mxu0 %v59_v2  ;;  %v56_v3 = vld [vmem:[%s512_s1 + $0x150] sm:$0xff]  ;;  %v54_v4 = vld [vmem:[%s512_s1 + $0x140] sm:$0xff]  ;;  %v53_v5 = vld [vmem:[%s512_s1 + $0x138] sm:$0xff] }
   0x3   :  { %v51_v6 = vld [vmem:[%s512_s1 + $0x128] sm:$0xff]  ;;  %v50_v7 = vld [vmem:[%s512_s1 + $0x120] sm:$0xff]  ;;  %v48_v8 = vld [vmem:[%s512_s1 + $0x110] sm:$0xff] }
   0x4   :  { %86 = vmatpush.msra.mxu1 %v57_v1  ;;  %63 = vmatpush.msra.mxu0 %v56_v3  ;;  %v47_v9 = vld [vmem:[%s512_s1 + $0x108] sm:$0xff]  ;;  %v45_v10 = vld [vmem:[%s512_s1 + $0xf8] sm:$0xff]  ;;  %v44_v11 = vld [vmem:[%s512_s1 + $0xf0] sm:$0xff] }
   0x5   :  { %v42_v12 = vld [vmem:[%s512_s1 + $0xe0] sm:$0xff]  ;;  %v41_v13 = vld [vmem:[%s512_s1 + $0xd8] sm:$0xff] }
   0x6   :  { %87 = vmatpush.msra.mxu1 %v54_v4  ;;  %64 = vmatpush.msra.mxu0 %v53_v5 }
   0x8   :  { %88 = vmatpush.msra.mxu1 %v51_v6  ;;  %65 = vmatpush.msra.mxu0 %v50_v7 }
   0xa   :  { %89 = vmatpush.msra.mxu1 %v48_v8  ;;  %66 = vmatpush.msra.mxu0 %v47_v9 }
   0xc   :  { %90 = vmatpush.msra.mxu1 %v45_v10  ;;  %67 = vmatpush.msra.mxu0 %v44_v11 }
   0xd   :  { %7 = vsyncpa [#allocation3], 0  ;;  %v39_v14 = vld [vmem:[%s512_s1 + $0xc8] sm:$0xff]  ;;  %v38_v15 = vld [vmem:[%s512_s1 + $0xc0] sm:$0xff]  ;;  %v131_v43 = vlaneseq  ;;  %v333_v51 = vmov -1e+30  }
   0xe   :  { %91 = vmatpush.msra.mxu1 %v42_v12  ;;  %68 = vmatpush.msra.mxu0 %v41_v13  ;;  %v36_v16 = vld [vmem:[%s512_s1 + $0xb0] sm:$0xff]  ;;  %v35_v17 = vld [vmem:[%s512_s1 + $0xa8] sm:$0xff]  ;;  %v33_v18 = vld [vmem:[%s512_s1 + $0x98] sm:$0xff]  ;;  %vm177_vm1 = vcmask 64512   ;;  %vm272_vm10 = vcmask 130048   ;;  %s281_s26 = sshll.u32 %s513_s2, 4  ;;  %s282_s26 = int_to_ptr.hbm [resolvable:$true] %s281_s26 }
   0xf   :  { %v32_v19 = vld [vmem:[%s512_s1 + $0x90] sm:$0xff]  ;;  %v30_v20 = vld [vmem:[%s512_s1 + $0x80] sm:$0xff]  ;;  %v29_v21 = vld [vmem:[%s512_s1 + $0x78] sm:$0xff]  ;;  %v132_v46 = vshrl.u32 %v131_v43, 7  ;;  %v134_v47 = vand.u32 127, %v131_v43  ;;  %s335_s27 = smov 128  }
  0x10   :  { %92 = vmatpush.msra.mxu1 %v39_v14  ;;  %69 = vmatpush.msra.mxu0 %v38_v15  ;;  %v27_v22 = vld [vmem:[%s512_s1 + $0x68] sm:$0xff]  ;;  %v26_v23 = vld [vmem:[%s512_s1 + $0x60] sm:$0xff]  ;;  %v24_v24 = vld [vmem:[%s512_s1 + $0x50] sm:$0xff]  ;;  %s336_s28 = smov 8  }
  0x11   :  { %v23_v25 = vld [vmem:[%s512_s1 + $0x48] sm:$0xff]  ;;  %v21_v26 = vld [vmem:[%s512_s1 + $0x38] sm:$0xff]  ;;  %v20_v27 = vld [vmem:[%s512_s1 + $0x30] sm:$0xff]  ;;  %vm135_vm0 = vcmp.le.s32.totalorder %v134_v47, %v132_v46 }
  0x12   :  { %93 = vmatpush.msra.mxu1 %v36_v16  ;;  %70 = vmatpush.msra.mxu0 %v35_v17  ;;  %v18_v28 = vld [vmem:[%s512_s1 + $0x20] sm:$0xff]  ;;  %v17_v29 = vld [vmem:[%s512_s1 + $0x18] sm:$0xff]  ;;  %v15_v30 = vld [vmem:[%s512_s1 + $0x8] sm:$0xff]  ;;  %v136_v52 = vsel %vm135_vm0, 0.0, %v333_v51 }
  0x13   :  { %v14_v31 = vld [vmem:[%s512_s1] sm:$0xff]  ;;  %v13_v33 = vld [vmem:[%s511_s0 + $0x8] sm:$0xff]  ;;  %v61_v38 = vld [vmem:[%s512_s1 + $0x178] sm:$0xff] }
  0x14   :  { %94 = vmatpush.msra.mxu1 %v33_v18  ;;  %71 = vmatpush.msra.mxu0 %v32_v19  ;;  %v12_v32 = vld [vmem:[%s511_s0] sm:$0xff]  ;;  %v55_v40 = vld [vmem:[%s512_s1 + $0x148] sm:$0xff]  ;;  %v52_v41 = vld [vmem:[%s512_s1 + $0x130] sm:$0xff] }
  0x15   :  { %v58_v39 = vld [vmem:[%s512_s1 + $0x160] sm:$0xff]  ;;  %108 = vmatpush.msra.mxu2 %v61_v38  ;;  %v49_v42 = vld [vmem:[%s512_s1 + $0x118] sm:$0xff]  ;;  %v43_v45 = vld [vmem:[%s512_s1 + $0xe8] sm:$0xff] }
  0x16   :  { %95 = vmatpush.msra.mxu1 %v30_v20  ;;  %72 = vmatpush.msra.mxu0 %v29_v21  ;;  %v46_v44 = vld [vmem:[%s512_s1 + $0x100] sm:$0xff]  ;;  %v40_v48 = vld [vmem:[%s512_s1 + $0xd0] sm:$0xff]  ;;  %v37_v49 = vld [vmem:[%s512_s1 + $0xb8] sm:$0xff] }
  0x17   :  { %109 = vmatpush.msra.mxu2 %v58_v39  ;;  %v34_v50 = vld [vmem:[%s512_s1 + $0xa0] sm:$0xff]  ;;  %v31_v59 = vld [vmem:[%s512_s1 + $0x88] sm:$0xff]  ;;  %v28_v60 = vld [vmem:[%s512_s1 + $0x70] sm:$0xff] }
  0x18   :  { %96 = vmatpush.msra.mxu1 %v27_v22  ;;  %73 = vmatpush.msra.mxu0 %v26_v23  ;;  %v25_v61 = vld [vmem:[%s512_s1 + $0x58] sm:$0xff]  ;;  %v22_v62 = vld [vmem:[%s512_s1 + $0x40] sm:$0xff]  ;;  %v19_v63 = vld [vmem:[%s512_s1 + $0x28] sm:$0xff] }
  0x19   :  { %110 = vmatpush.msra.mxu2 %v55_v40  ;;  %v16_v0 = vld [vmem:[%s512_s1 + $0x10] sm:$0xff]  ;;  %s334_s1 = smov [#allocation2]  }
  0x1a   :  { %97 = vmatpush.msra.mxu1 %v24_v24  ;;  %74 = vmatpush.msra.mxu0 %v23_v25  ;;  %s279_s24 = sshll.u32 %s334_s1, 4  ;;  %s280_s24 = int_to_ptr.vmem [resolvable:$true] %s279_s24 }
  0x1b   :  { %111 = vmatpush.msra.mxu2 %v52_v41 }
  0x1c   :  { %98 = vmatpush.msra.mxu1 %v21_v26  ;;  %75 = vmatpush.msra.mxu0 %v20_v27 }
  0x1d   :  { %112 = vmatpush.msra.mxu2 %v49_v42 }
  0x1e   :  { %99 = vmatpush.msra.mxu1 %v18_v28  ;;  %76 = vmatpush.msra.mxu0 %v17_v29 }
  0x1f   :  { %113 = vmatpush.msra.mxu2 %v46_v44 }
  0x20   :  { %100 = vmatpush.msra.mxu1 %v15_v30  ;;  %77 = vmatpush.msra.mxu0 %v14_v31 }
  0x21   :  { %101 = vmatmul.f32.vlgmr.msra.gmra.mxu1 %v12_v32  ;;  %78 = vmatmul.f32.vlgmr.msra.gmra.mxu0 %v12_v32 }
  0x22   :  { %114 = vmatpush.msra.mxu2 %v43_v45 }
  0x24   :  { %115 = vmatpush.msra.mxu2 %v40_v48 }
  0x26   :  { %116 = vmatpush.msra.mxu2 %v37_v49 }
  0x28   :  { %117 = vmatpush.msra.mxu2 %v34_v50 }
  0x29   :  { %104 = vmatmul.f32.gmra.mxu1 %v13_v33  ;;  %81 = vmatmul.f32.gmra.mxu0 %v13_v33 }
  0x2a   :  { %118 = vmatpush.msra.mxu2 %v31_v59 }
  0x2c   :  { %119 = vmatpush.msra.mxu2 %v28_v60 }
  0x2e   :  { %120 = vmatpush.msra.mxu2 %v25_v61 }
  0x30   :  { %121 = vmatpush.msra.mxu2 %v22_v62 }
  0x32   :  { %122 = vmatpush.msra.mxu2 %v19_v63 }
  0x34   :  { %123 = vmatpush.msra.mxu2 %v16_v0 }
  0x35   :  { %124 = vmatmul.f32.vlgmr.msra.gmra.mxu2 %v12_v32 }
  0x3d   :  { %127 = vmatmul.f32.gmra.mxu2 %v13_v33 }
  0x9e   :  { %v102_v34 = vpop.f32.mrf.mxu1  ;;  %v79_v35 = vpop.f32.mrf.mxu0 }
  0x9f   :  { %152 = vmatpush.xpose.msra.mxu3 %v102_v34 }
  0xa2   :  { %153 = vmatmul.f32.vlgmr.msra.gmra.mxu3 %v79_v35 }
  0xa6   :  { %v105_v36 = vpop.f32.mrf.mxu1  ;;  %v82_v37 = vpop.f32.mrf.mxu0 }
  0xa7   :  { %172 = vmatpush.xpose.msrb.mxu3 %v105_v36 }
  0xaa   :  { %173 = vmatmul.f32.vlgmr.msrb.gmra.mxu3 %v82_v37 }
  0xb8   :  { %v125_v11 = vpop.f32.mrf.mxu2 }
  0xb9   :  { %244 = vmatpush.msra.mxu3 %v125_v11 }
  0xc0   :  { %v128_v12 = vpop.f32.mrf.mxu2 }
  0xc1   :  { %267 = vmatpush.msrb.mxu3 %v128_v12 }
 0x125   :  { %v154_v53 = vpop.f32.mrf.mxu3 }
 0x126   :  { %v155_v54 = vadd.f32 %v154_v53, %v136_v52 }
 0x128   :  { %v178_v55 = vsel %vm177_vm1, %v155_v54, -inf }
 0x129   :  { %179 = vmax.xlane.f32.xlu0 %v178_v55 }
 0x12d   :  { %v174_v56 = vpop.f32.mrf.mxu3 }
 0x12e   :  { %v175_v57 = vadd.f32 %v174_v56, %v136_v52 }
 0x130   :  { %v181_v58 = vsel %vm177_vm1, %v175_v57, -inf }
 0x131   :  { %182 = vmax.xlane.f32.xlu0 %v181_v58 }
 0x19c   :  { %v180_v1 = vpop.xlane.xlu0 %179 }
 0x19d   :  { %v184_v2 = vsub.f32 %v155_v54, %v180_v1 }
 0x19f   :  { %v186_v3 = vmul.f32 1.442695, %v184_v2 }
 0x1a1   :  { %299 = vpow2.f32 %v186_v3 }
 0x1a4   :  { %v183_v4 = vpop.xlane.xlu0 %182 }
 0x1a5   :  { %v185_v5 = vsub.f32 %v175_v57, %v183_v4 }
 0x1a7   :  { %v300_v6 = vpop.eup %299  ;;  %v188_v7 = vmul.f32 1.442695, %v185_v5 }
 0x1a8   :  { %v190_v8 = vsel %vm177_vm1, %v300_v6, 0.0 }
 0x1a9   :  { %301 = vpow2.f32 %v188_v7  ;;  %191 = vadd.xlane.f32.xlu1 %v190_v8 }
 0x1af   :  { %v302_v9 = vpop.eup %301 }
 0x1b0   :  { %v193_v10 = vsel %vm177_vm1, %v302_v9, 0.0 }
 0x1b1   :  { %194 = vadd.xlane.f32.xlu1 %v193_v10 }
 0x21c   :  { %v192_v13 = vpop.xlane.xlu1 %191 }
 0x21d   :  { %303 = vrcp.f32 %v192_v13  ;;  %v207_v18 = vand.u32 2147483648, %v192_v13  ;;  %v205_v20 = vand.u32 2147483647, %v192_v13  ;;  %vm201_vm3 = vweird.f32 %v192_v13 }
 0x21f   :  { %v208_v23 = vor.u32 1.1754944e-38, %v207_v18  ;;  %vm206_vm5 = vcmp.eq.f32.partialorder %v205_v20, 8.507059e+37 }
 0x223   :  { %v304_v14 = vpop.eup %303 }
 0x224   :  { %v197_v15 = vmul.f32 %v304_v14, %v192_v13  ;;  %v195_v16 = vpop.xlane.xlu1 %194  ;;  %vm202_vm2 = vweird.f32 %v304_v14 }
 0x225   :  { %305 = vrcp.f32 %v195_v16  ;;  %vm203_vm4 = vmor %vm201_vm3, %vm202_vm2  ;;  %v221_v29 = vand.u32 2147483648, %v195_v16  ;;  %v219_v31 = vand.u32 2147483647, %v195_v16  ;;  %vm215_vm7 = vweird.f32 %v195_v16 }
 0x226   :  { %v198_v17 = vsub.f32 1.0, %v197_v15 }
 0x227   :  { %v222_v33 = vor.u32 1.1754944e-38, %v221_v29  ;;  %vm220_vm9 = vcmp.eq.f32.partialorder %v219_v31, 8.507059e+37 }
 0x228   :  { %v199_v19 = vmul.f32 %v304_v14, %v198_v17 }
 0x22a   :  { %v200_v21 = vadd.f32 %v304_v14, %v199_v19 }
 0x22b   :  { %v306_v22 = vpop.eup %305 }
 0x22c   :  { %v204_v24 = vsel %vm203_vm4, %v304_v14, %v200_v21  ;;  %v211_v25 = vmul.f32 %v306_v22, %v195_v16  ;;  %vm216_vm6 = vweird.f32 %v306_v22 }
 0x22d   :  { %v209_v26 = vsel %vm206_vm5, %v208_v23, %v204_v24  ;;  %vm217_vm8 = vmor %vm215_vm7, %vm216_vm6 }
 0x22e   :  { %v212_v27 = vsub.f32 1.0, %v211_v25  ;;  %v224_v28 = vmul.f32 %v300_v6, %v209_v26 }
 0x230   :  { %v213_v30 = vmul.f32 %v306_v22, %v212_v27  ;;  %293 = vmatmul.msk.f32.vlgmr.msra.gmra.mxu3 %vm177_vm1, %v224_v28 }
 0x232   :  { %v214_v32 = vadd.f32 %v306_v22, %v213_v30 }
 0x234   :  { %v218_v34 = vsel %vm217_vm8, %v306_v22, %v214_v32 }
 0x235   :  { %v223_v35 = vsel %vm220_vm9, %v222_v33, %v218_v34 }
 0x236   :  { %v225_v36 = vmul.f32 %v302_v9, %v223_v35 }
 0x238   :  { %294 = vmatmul.msk.f32.vlgmr.msrb.gmra.mxu3 %vm177_vm1, %v225_v36 }
 0x2b3   :  { %v246_v37 = vpop.f32.mrf.mxu3 }
 0x2b4   :  { %273 = vst.msk [vmem:[#allocation2] sm:$0xff] %vm272_vm10, %v246_v37 }
 0x2bb   :  { %v269_v38 = vpop.f32.mrf.mxu3 }
 0x2bc   :  { %274 = vst.msk [vmem:[#allocation2 + $0x8] sm:$0xff] %vm272_vm10, %v269_v38 }
 0x2bd   :  { %287 = dma.vmem_to_hbm [thread:$0]  %s280_s24, 256, %s282_s26, [#allocation3], %s335_s27, %s335_s27, %s336_s28  }
 0x2be   :  { %331 = dma.done.wait [#allocation3], 256  }
 0x2bf   :  { %332 = vsyncadd [#allocation3], 4294967040 }
 0x2c0   :  { %292 = vsyncpa [#allocation3], 1 }

</bundles_post_ra>
